<compile_context>
chip_gen: v5e
topology: v5e:2x2
jax: 0.10.0
libtpu: 0.0.40
codegen_flags: <defaults>
</compile_context>

<pallas_src>
import functools
import math

import jax
import jax.numpy as jnp
from jax.experimental import pallas as pl
from jax.experimental.pallas import tpu as pltpu


def _round_up(a, b):
    return (a + b - 1) // b * b


def _unit_transformer_kernel(xq_ref, xkv_ref, wq_ref, bq_ref, wkv_ref, bkv_ref,
                             o_ref, q_scr, m_scr, l_scr, acc_scr, *,
                             d_pad, n_valid, tk, scale, activation):
    ki = pl.program_id(1)
    nk = pl.num_programs(1)

    @pl.when(ki == 0)
    def _init():
        # Q projection once per query tile (hoisted off the KV loop). Weights are
        # already [in, out]; fold 1/sqrt(d) into q so the score tile is never scaled.
        q = jnp.dot(xq_ref[...], wq_ref[...], preferred_element_type=jnp.float32)
        q = (q + bq_ref[...]) * scale
        q_scr[...] = q.astype(q_scr.dtype)
        m_scr[...] = jnp.full_like(m_scr, -jnp.inf)
        l_scr[...] = jnp.zeros_like(l_scr)
        acc_scr[...] = jnp.zeros_like(acc_scr)

    # Fused K/V projection for this KV tile: one MXU push -> [tk, 2*d_pad] (f32 acc).
    kv = jnp.dot(xkv_ref[...], wkv_ref[...],
                 preferred_element_type=jnp.float32) + bkv_ref[...]
    k = kv[:, :d_pad].astype(jnp.bfloat16)
    v = kv[:, d_pad:].astype(jnp.bfloat16)

    # Scores: contract the last dim of both operands (no in-kernel transpose).
    s = jax.lax.dot_general(q_scr[...], k, (((1,), (1,)), ((), ())),
                            preferred_element_type=jnp.float32)

    # Mask KV columns that come from row padding (N padded up to the tile size).
    kv_idx = ki * tk + jax.lax.broadcasted_iota(jnp.int32, s.shape, 1)
    valid = kv_idx < n_valid

    if activation == "softmax":
        s = jnp.where(valid, s, -jnp.inf)
        m_prev = m_scr[...]
        m_new = jnp.maximum(m_prev, jnp.max(s, axis=-1, keepdims=True))
        alpha = jnp.exp(m_prev - m_new)
        p = jnp.exp(s - m_new)
        l_scr[...] = alpha * l_scr[...] + jnp.sum(p, axis=-1, keepdims=True)
        acc_scr[...] = alpha * acc_scr[...] + jnp.dot(
            p.astype(jnp.bfloat16), v, preferred_element_type=jnp.float32)
        m_scr[...] = m_new
    elif activation == "relu":
        p = jnp.where(valid, jnp.maximum(s, 0.0), 0.0)
        acc_scr[...] += jnp.dot(p.astype(jnp.bfloat16), v,
                                preferred_element_type=jnp.float32)
    else:
        raise ValueError(f"unsupported activation: {activation}")

    @pl.when(ki == nk - 1)
    def _finalize():
        if activation == "softmax":
            inv_l = pl.reciprocal(l_scr[...], approx=True)
            o_ref[...] = (acc_scr[...] * inv_l).astype(o_ref.dtype)
        else:
            o_ref[...] = acc_scr[...].astype(o_ref.dtype)


def unit_transformer(x, wq, bq, wk, bk, wv, bv, *, output_dim,
                     activation_function="softmax", tile=256):
    """x: [N, input_dim]; W*: [output_dim, input_dim] (PyTorch layout); b*: [output_dim]."""
    n, in_dim = x.shape

    # Lane-dense padding of the feature dims (multiples of 128).
    d_in_p = _round_up(in_dim, 128)
    d_out_p = _round_up(output_dim, 128)

    # Row tiling: 256-wide tiles fit comfortably in v7x's 64 MiB VMEM with
    # double-buffered inputs; clamp for tiny problems.
    tq = min(tile, _round_up(n, 8))
    tk = tq
    n_p = _round_up(n, tq)

    cdt = jnp.bfloat16  # MXU-native operand dtype; f32 accumulation in-kernel.

    def prep_w(w):  # PyTorch [out, in] -> padded, pre-transposed [in_p, out_p]
        wt = jnp.asarray(w).T.astype(cdt)
        return jnp.pad(wt, ((0, d_in_p - in_dim), (0, d_out_p - output_dim)))

    def prep_b(b):  # [out] -> padded [1, out_p] in f32 (added post-accumulation)
        return jnp.pad(jnp.asarray(b).astype(jnp.float32),
                       (0, d_out_p - output_dim)).reshape(1, d_out_p)

    wq_t = prep_w(wq)
    wkv_t = jnp.concatenate([prep_w(wk), prep_w(wv)], axis=1)   # [in_p, 2*out_p]
    bq_p = prep_b(bq)
    bkv_p = jnp.concatenate([prep_b(bk), prep_b(bv)], axis=1)   # [1, 2*out_p]

    x_p = jnp.pad(x.astype(cdt), ((0, n_p - n), (0, d_in_p - in_dim)))

    kernel = functools.partial(
        _unit_transformer_kernel,
        d_pad=d_out_p,
        n_valid=n,
        tk=tk,
        scale=1.0 / math.sqrt(output_dim),
        activation=activation_function,
    )

    grid = (n_p // tq, n_p // tk)
    grid_spec = pltpu.PrefetchScalarGridSpec(
        num_scalar_prefetch=0,
        grid=grid,
        in_specs=[
            pl.BlockSpec((tq, d_in_p), lambda qi, ki: (qi, 0)),          # x (query rows)
            pl.BlockSpec((tk, d_in_p), lambda qi, ki: (ki, 0)),          # x (kv rows)
            pl.BlockSpec((d_in_p, d_out_p), lambda qi, ki: (0, 0)),      # Wq^T (resident)
            pl.BlockSpec((1, d_out_p), lambda qi, ki: (0, 0)),           # bq (resident)
            pl.BlockSpec((d_in_p, 2 * d_out_p), lambda qi, ki: (0, 0)),  # [Wk|Wv]^T
            pl.BlockSpec((1, 2 * d_out_p), lambda qi, ki: (0, 0)),       # [bk|bv]
        ],
        out_specs=pl.BlockSpec((tq, d_out_p), lambda qi, ki: (qi, 0)),
        scratch_shapes=[
            pltpu.VMEM((tq, d_out_p), cdt),          # q tile (scaled, bf16)
            pltpu.VMEM((tq, 1), jnp.float32),        # running max
            pltpu.VMEM((tq, 1), jnp.float32),        # running denom
            pltpu.VMEM((tq, d_out_p), jnp.float32),  # output accumulator
        ],
    )

    out_p = pl.pallas_call(
        kernel,
        out_shape=jax.ShapeDtypeStruct((n_p, d_out_p), x.dtype),
        grid_spec=grid_spec,
        compiler_params=pltpu.CompilerParams(
            dimension_semantics=("parallel", "arbitrary"),
            vmem_limit_bytes=64 * 1024 * 1024,
        ),
    )(x_p, x_p, wq_t, bq_p, wkv_t, bkv_p)

    return out_p[:n, :output_dim]


def _reference(x, wq, bq, wk, bk, wv, bv, output_dim, activation_function):
    q = x @ wq.T + bq
    k = x @ wk.T + bk
    v = x @ wv.T + bv
    attn = (q @ k.T) / jnp.sqrt(jnp.float32(output_dim))
    if activation_function == "softmax":
        attn = jax.nn.softmax(attn, axis=-1)
    else:
        attn = jax.nn.relu(attn)
    return attn @ v


if __name__ == "__main__":
    key = jax.random.PRNGKey(0)
    N, input_dim, output_dim = 8, 32, 32

    k_x, k_wq, k_bq, k_wk, k_bk, k_wv, k_bv = jax.random.split(key, 7)
    # Deterministic, PyTorch-Linear-like init: uniform(-1/sqrt(in), 1/sqrt(in)).
    bound = 1.0 / jnp.sqrt(jnp.float32(input_dim))
    x = jax.random.normal(k_x, (N, input_dim), dtype=jnp.float32)
    wq = jax.random.uniform(k_wq, (output_dim, input_dim), jnp.float32, -bound, bound)
    bq = jax.random.uniform(k_bq, (output_dim,), jnp.float32, -bound, bound)
    wk = jax.random.uniform(k_wk, (output_dim, input_dim), jnp.float32, -bound, bound)
    bk = jax.random.uniform(k_bk, (output_dim,), jnp.float32, -bound, bound)
    wv = jax.random.uniform(k_wv, (output_dim, input_dim), jnp.float32, -bound, bound)
    bv = jax.random.uniform(k_bv, (output_dim,), jnp.float32, -bound, bound)

    # bf16 MXU operands with f32 accumulation -> compare against f32 reference
    # at a bf16-appropriate tolerance.
    for act_fn in ("softmax", "relu"):
        out = unit_transformer(x, wq, bq, wk, bk, wv, bv,
                               output_dim=output_dim,
                               activation_function=act_fn)
        out = jax.block_until_ready(out)
        ref = _reference(x, wq, bq, wk, bk, wv, bv, output_dim, act_fn)
        assert out.shape == (N, output_dim)
        assert jnp.allclose(out, ref, atol=2e-2, rtol=2e-2), f"mismatch ({act_fn})"

    print("KERNEL_OK")
</pallas_src>

<mosaic_0001>
module attributes {stable_mosaic.version = 11 : i64} {
  func.func @_unit_transformer_kernel(%arg0: i32, %arg1: i32, %arg2: memref<8x128xbf16, #tpu.memory_space<vmem>>, %arg3: memref<8x128xbf16, #tpu.memory_space<vmem>>, %arg4: memref<128x128xbf16, #tpu.memory_space<vmem>>, %arg5: memref<1x128xf32, #tpu.memory_space<vmem>>, %arg6: memref<128x256xbf16, #tpu.memory_space<vmem>>, %arg7: memref<1x256xf32, #tpu.memory_space<vmem>>, %arg8: memref<8x128xf32, #tpu.memory_space<vmem>>, %arg9: memref<8x128xbf16, #tpu.memory_space<vmem>>, %arg10: memref<8x1xf32, #tpu.memory_space<vmem>>, %arg11: memref<8x1xf32, #tpu.memory_space<vmem>>, %arg12: memref<8x128xf32, #tpu.memory_space<vmem>>) attributes {dimension_semantics = [#tpu.dimension_semantics<parallel>, #tpu.dimension_semantics<arbitrary>], iteration_bounds = array<i64: 1, 1>, scalar_prefetch = 0 : i64, scratch_operands = 4 : i64, tpu.core_type = #tpu.core_type<tc>, window_params = [{transform_indices = @transform_0, window_bounds = array<i64: 8, 128>}, {transform_indices = @transform_1, window_bounds = array<i64: 8, 128>}, {pipeline_mode = #tpu.pipeline_mode<synchronous>, transform_indices = @transform_2, window_bounds = array<i64: 128, 128>}, {pipeline_mode = #tpu.pipeline_mode<synchronous>, transform_indices = @transform_3, window_bounds = array<i64: 1, 128>}, {pipeline_mode = #tpu.pipeline_mode<synchronous>, transform_indices = @transform_4, window_bounds = array<i64: 128, 256>}, {pipeline_mode = #tpu.pipeline_mode<synchronous>, transform_indices = @transform_5, window_bounds = array<i64: 1, 256>}, {transform_indices = @transform_6, window_bounds = array<i64: 8, 128>}]} {
    %c0_i32 = arith.constant 0 : i32
    %0 = arith.cmpi eq, %arg1, %c0_i32 : i32
    %1 = arith.extui %0 : i1 to i32
    %c0_i32_0 = arith.constant 0 : i32
    %2 = arith.cmpi ne, %1, %c0_i32_0 : i32
    scf.if %2 {
      %c0_28 = arith.constant 0 : index
      %c0_29 = arith.constant 0 : index
      %49 = vector.load %arg2[%c0_28, %c0_29] : memref<8x128xbf16, #tpu.memory_space<vmem>>, vector<8x128xbf16>
      %c0_30 = arith.constant 0 : index
      %c0_31 = arith.constant 0 : index
      %50 = vector.load %arg4[%c0_30, %c0_31] : memref<128x128xbf16, #tpu.memory_space<vmem>>, vector<128x128xbf16>
      %cst_32 = arith.constant dense<0.000000e+00> : vector<8x128xf32>
      %51 = tpu.matmul %49, %50, %cst_32 {dimension_numbers = #tpu.dot_dimension_numbers<[1], [0], [0], [1], [0, 0, 1, 1], [], []>} : vector<8x128xbf16>, vector<128x128xbf16>, vector<8x128xf32> -> vector<8x128xf32>
      %c0_33 = arith.constant 0 : index
      %c0_34 = arith.constant 0 : index
      %52 = vector.load %arg5[%c0_33, %c0_34] : memref<1x128xf32, #tpu.memory_space<vmem>>, vector<1x128xf32>
      %53 = vector.broadcast %52 : vector<1x128xf32> to vector<8x128xf32>
      %54 = arith.addf %51, %53 : vector<8x128xf32>
      %cst_35 = arith.constant 0.176776692 : f32
      %55 = vector.broadcast %cst_35 : f32 to vector<8x128xf32>
      %56 = arith.mulf %54, %55 : vector<8x128xf32>
      %57 = arith.truncf %56 : vector<8x128xf32> to vector<8x128xbf16>
      %c0_36 = arith.constant 0 : index
      %c0_37 = arith.constant 0 : index
      %58 = vector.load %arg9[%c0_36, %c0_37] : memref<8x128xbf16, #tpu.memory_space<vmem>>, vector<8x128xbf16>
      tpu.vector_store %arg9[%c0_36, %c0_37], %57 {strides = array<i32>} : memref<8x128xbf16, #tpu.memory_space<vmem>>, vector<8x128xbf16>,
      %cst_38 = arith.constant 0xFF800000 : f32
      %59 = vector.broadcast %cst_38 : f32 to vector<8x1xf32>
      %c0_39 = arith.constant 0 : index
      %c0_40 = arith.constant 0 : index
      %60 = vector.load %arg10[%c0_39, %c0_40] : memref<8x1xf32, #tpu.memory_space<vmem>>, vector<8x1xf32>
      tpu.vector_store %arg10[%c0_39, %c0_40], %59 {strides = array<i32>} : memref<8x1xf32, #tpu.memory_space<vmem>>, vector<8x1xf32>,
      %cst_41 = arith.constant 0.000000e+00 : f32
      %61 = vector.broadcast %cst_41 : f32 to vector<8x1xf32>
      %c0_42 = arith.constant 0 : index
      %c0_43 = arith.constant 0 : index
      %62 = vector.load %arg11[%c0_42, %c0_43] : memref<8x1xf32, #tpu.memory_space<vmem>>, vector<8x1xf32>
      tpu.vector_store %arg11[%c0_42, %c0_43], %61 {strides = array<i32>} : memref<8x1xf32, #tpu.memory_space<vmem>>, vector<8x1xf32>,
      %cst_44 = arith.constant 0.000000e+00 : f32
      %63 = vector.broadcast %cst_44 : f32 to vector<8x128xf32>
      %c0_45 = arith.constant 0 : index
      %c0_46 = arith.constant 0 : index
      %64 = vector.load %arg12[%c0_45, %c0_46] : memref<8x128xf32, #tpu.memory_space<vmem>>, vector<8x128xf32>
      tpu.vector_store %arg12[%c0_45, %c0_46], %63 {strides = array<i32>} : memref<8x128xf32, #tpu.memory_space<vmem>>, vector<8x128xf32>,
    } else {
    }
    %c0 = arith.constant 0 : index
    %c0_1 = arith.constant 0 : index
    %3 = vector.load %arg3[%c0, %c0_1] : memref<8x128xbf16, #tpu.memory_space<vmem>>, vector<8x128xbf16>
    %c0_2 = arith.constant 0 : index
    %c0_3 = arith.constant 0 : index
    %4 = vector.load %arg6[%c0_2, %c0_3] : memref<128x256xbf16, #tpu.memory_space<vmem>>, vector<128x256xbf16>
    %cst = arith.constant dense<0.000000e+00> : vector<8x256xf32>
    %5 = tpu.matmul %3, %4, %cst {dimension_numbers = #tpu.dot_dimension_numbers<[1], [0], [0], [1], [0, 0, 1, 1], [], []>} : vector<8x128xbf16>, vector<128x256xbf16>, vector<8x256xf32> -> vector<8x256xf32>
    %c0_4 = arith.constant 0 : index
    %c0_5 = arith.constant 0 : index
    %6 = vector.load %arg7[%c0_4, %c0_5] : memref<1x256xf32, #tpu.memory_space<vmem>>, vector<1x256xf32>
    %7 = vector.broadcast %6 : vector<1x256xf32> to vector<8x256xf32>
    %8 = arith.addf %5, %7 : vector<8x256xf32>
    %9 = vector.extract_strided_slice %8 {offsets = [0, 0], sizes = [8, 128], strides = [1, 1]} : vector<8x256xf32> to vector<8x128xf32>
    %10 = arith.truncf %9 : vector<8x128xf32> to vector<8x128xbf16>
    %11 = vector.extract_strided_slice %8 {offsets = [0, 128], sizes = [8, 128], strides = [1, 1]} : vector<8x256xf32> to vector<8x128xf32>
    %12 = arith.truncf %11 : vector<8x128xf32> to vector<8x128xbf16>
    %c0_6 = arith.constant 0 : index
    %c0_7 = arith.constant 0 : index
    %13 = vector.load %arg9[%c0_6, %c0_7] : memref<8x128xbf16, #tpu.memory_space<vmem>>, vector<8x128xbf16>
    %cst_8 = arith.constant dense<0.000000e+00> : vector<8x8xf32>
    %14 = tpu.matmul %13, %10, %cst_8 {dimension_numbers = #tpu.dot_dimension_numbers<[1], [1], [0], [0], [0, 0, 1, 0], [], []>} : vector<8x128xbf16>, vector<8x128xbf16>, vector<8x8xf32> -> vector<8x8xf32>
    %c8_i32 = arith.constant 8 : i32
    %15 = arith.muli %arg1, %c8_i32 : i32
    %16 = tpu.iota {dimensions = array<i32: 1>} : vector<8x8xi32>
    %17 = vector.broadcast %15 : i32 to vector<8x8xi32>
    %18 = arith.addi %17, %16 : vector<8x8xi32>
    %c8_i32_9 = arith.constant 8 : i32
    %19 = vector.broadcast %c8_i32_9 : i32 to vector<8x8xi32>
    %20 = arith.cmpi slt, %18, %19 : vector<8x8xi32>
    %cst_10 = arith.constant 0xFF800000 : f32
    %21 = vector.broadcast %cst_10 : f32 to vector<8x8xf32>
    %22 = arith.select %20, %14, %21 : vector<8x8xi1>, vector<8x8xf32>
    %c0_11 = arith.constant 0 : index
    %c0_12 = arith.constant 0 : index
    %23 = vector.load %arg10[%c0_11, %c0_12] : memref<8x1xf32, #tpu.memory_space<vmem>>, vector<8x1xf32>
    %cst_13 = arith.constant dense<0xFF800000> : vector<8xf32>
    %24 = vector.multi_reduction <maximumf>, %22, %cst_13 [1] : vector<8x8xf32> to vector<8xf32>
    %25 = vector.shape_cast %24 : vector<8xf32> to vector<8x1xf32>
    %26 = arith.maximumf %23, %25 : vector<8x1xf32>
    %27 = arith.subf %23, %26 : vector<8x1xf32>
    %28 = math.exp %27 : vector<8x1xf32>
    %29 = vector.broadcast %26 : vector<8x1xf32> to vector<8x8xf32>
    %30 = arith.subf %22, %29 : vector<8x8xf32>
    %31 = math.exp %30 : vector<8x8xf32>
    %c0_14 = arith.constant 0 : index
    %c0_15 = arith.constant 0 : index
    %32 = vector.load %arg11[%c0_14, %c0_15] : memref<8x1xf32, #tpu.memory_space<vmem>>, vector<8x1xf32>
    %33 = arith.mulf %28, %32 : vector<8x1xf32>
    %cst_16 = arith.constant dense<0.000000e+00> : vector<8xf32>
    %34 = vector.multi_reduction <add>, %31, %cst_16 [1] : vector<8x8xf32> to vector<8xf32>
    %35 = vector.shape_cast %34 : vector<8xf32> to vector<8x1xf32>
    %36 = arith.addf %33, %35 : vector<8x1xf32>
    %c0_17 = arith.constant 0 : index
    %c0_18 = arith.constant 0 : index
    %37 = vector.load %arg11[%c0_17, %c0_18] : memref<8x1xf32, #tpu.memory_space<vmem>>, vector<8x1xf32>
    tpu.vector_store %arg11[%c0_17, %c0_18], %36 {strides = array<i32>} : memref<8x1xf32, #tpu.memory_space<vmem>>, vector<8x1xf32>,
    %c0_19 = arith.constant 0 : index
    %c0_20 = arith.constant 0 : index
    %38 = vector.load %arg12[%c0_19, %c0_20] : memref<8x128xf32, #tpu.memory_space<vmem>>, vector<8x128xf32>
    %39 = vector.broadcast %28 : vector<8x1xf32> to vector<8x128xf32>
    %40 = arith.mulf %39, %38 : vector<8x128xf32>
    %41 = arith.truncf %31 : vector<8x8xf32> to vector<8x8xbf16>
    %cst_21 = arith.constant dense<0.000000e+00> : vector<8x128xf32>
    %42 = tpu.matmul %41, %12, %cst_21 {dimension_numbers = #tpu.dot_dimension_numbers<[1], [0], [0], [1], [0, 0, 1, 1], [], []>} : vector<8x8xbf16>, vector<8x128xbf16>, vector<8x128xf32> -> vector<8x128xf32>
    %43 = arith.addf %40, %42 : vector<8x128xf32>
    %c0_22 = arith.constant 0 : index
    %c0_23 = arith.constant 0 : index
    %44 = vector.load %arg12[%c0_22, %c0_23] : memref<8x128xf32, #tpu.memory_space<vmem>>, vector<8x128xf32>
    tpu.vector_store %arg12[%c0_22, %c0_23], %43 {strides = array<i32>} : memref<8x128xf32, #tpu.memory_space<vmem>>, vector<8x128xf32>,
    %c0_24 = arith.constant 0 : index
    %c0_25 = arith.constant 0 : index
    %45 = vector.load %arg10[%c0_24, %c0_25] : memref<8x1xf32, #tpu.memory_space<vmem>>, vector<8x1xf32>
    tpu.vector_store %arg10[%c0_24, %c0_25], %26 {strides = array<i32>} : memref<8x1xf32, #tpu.memory_space<vmem>>, vector<8x1xf32>,
    %c0_i32_26 = arith.constant 0 : i32
    %46 = arith.cmpi eq, %arg1, %c0_i32_26 : i32
    %47 = arith.extui %46 : i1 to i32
    %c0_i32_27 = arith.constant 0 : i32
    %48 = arith.cmpi ne, %47, %c0_i32_27 : i32
    scf.if %48 {
      %c0_28 = arith.constant 0 : index
      %c0_29 = arith.constant 0 : index
      %49 = vector.load %arg11[%c0_28, %c0_29] : memref<8x1xf32, #tpu.memory_space<vmem>>, vector<8x1xf32>
      %50 = tpu.reciprocal %49 {approx = true} : vector<8x1xf32> -> vector<8x1xf32>
      %c0_30 = arith.constant 0 : index
      %c0_31 = arith.constant 0 : index
      %51 = vector.load %arg12[%c0_30, %c0_31] : memref<8x128xf32, #tpu.memory_space<vmem>>, vector<8x128xf32>
      %52 = vector.broadcast %50 : vector<8x1xf32> to vector<8x128xf32>
      %53 = arith.mulf %51, %52 : vector<8x128xf32>
      %c0_32 = arith.constant 0 : index
      %c0_33 = arith.constant 0 : index
      %54 = vector.load %arg8[%c0_32, %c0_33] : memref<8x128xf32, #tpu.memory_space<vmem>>, vector<8x128xf32>
      tpu.vector_store %arg8[%c0_32, %c0_33], %53 {strides = array<i32>} : memref<8x128xf32, #tpu.memory_space<vmem>>, vector<8x128xf32>,
    } else {
    }
    return
  }
  func.func @transform_0(%arg0: i32, %arg1: i32) -> (i32, i32) {
    %c0_i32 = arith.constant 0 : i32
    %c0_i32_0 = arith.constant 0 : i32
    return %arg0, %c0_i32 : i32, i32
  }
  func.func @transform_1(%arg0: i32, %arg1: i32) -> (i32, i32) {
    %c0_i32 = arith.constant 0 : i32
    %c0_i32_0 = arith.constant 0 : i32
    return %arg1, %c0_i32 : i32, i32
  }
  func.func @transform_2(%arg0: i32, %arg1: i32) -> (i32, i32) {
    %c0_i32 = arith.constant 0 : i32
    %c0_i32_0 = arith.constant 0 : i32
    %c0_i32_1 = arith.constant 0 : i32
    return %c0_i32, %c0_i32_0 : i32, i32
  }
  func.func @transform_3(%arg0: i32, %arg1: i32) -> (i32, i32) {
    %c0_i32 = arith.constant 0 : i32
    %c0_i32_0 = arith.constant 0 : i32
    %c0_i32_1 = arith.constant 0 : i32
    return %c0_i32, %c0_i32_0 : i32, i32
  }
  func.func @transform_4(%arg0: i32, %arg1: i32) -> (i32, i32) {
    %c0_i32 = arith.constant 0 : i32
    %c0_i32_0 = arith.constant 0 : i32
    %c0_i32_1 = arith.constant 0 : i32
    return %c0_i32, %c0_i32_0 : i32, i32
  }
  func.func @transform_5(%arg0: i32, %arg1: i32) -> (i32, i32) {
    %c0_i32 = arith.constant 0 : i32
    %c0_i32_0 = arith.constant 0 : i32
    %c0_i32_1 = arith.constant 0 : i32
    return %c0_i32, %c0_i32_0 : i32, i32
  }
  func.func @transform_6(%arg0: i32, %arg1: i32) -> (i32, i32) {
    %c0_i32 = arith.constant 0 : i32
    %c0_i32_0 = arith.constant 0 : i32
    return %arg0, %c0_i32 : i32, i32
  }
}

</mosaic_0001>

<bundles_post_ra>
// kernel: tpu_custom_call.1
= control target key start
LH: loop header
LB: loop body
LE: loop exit
PB: predicated region body
PF: predicated region fallthrough
CT: control target
= control target key end

     0   :  { %11 = vsyncpa [#allocation7], 0  ;;  %s767_s0 = inlined_call_operand.hbm [shape: bf16[8,128], index: 0, kind: input, shape index: {}]   ;;  %s768_s1 = inlined_call_operand.hbm [shape: bf16[8,128], index: 1, kind: input, shape index: {}]   ;;  %s769_s2 = inlined_call_operand.hbm [shape: bf16[128,128], index: 2, kind: input, shape index: {}]   ;;  %s770_s3 = inlined_call_operand.vmem [shape: f32[1,128], index: 3, kind: input, shape index: {}]   ;;  %s771_s4 = inlined_call_operand.hbm [shape: bf16[128,256], index: 4, kind: input, shape index: {}]   ;;  %s772_s5 = inlined_call_operand.vmem [shape: f32[1,256], index: 5, kind: input, shape index: {}]   ;;  %s773_s6 = inlined_call_operand.hbm [shape: f32[8,128], index: 6, kind: output, shape index: {}]  }
   0x1   :  { %12 = vsyncpa [#allocation10], 0 }
   0x2   :  { %13 = vsyncpa [#allocation13], 0  ;;  %s31_s23 = sshll.u32 %s768_s1, 4  ;;  %s32_s23 = int_to_ptr.hbm [resolvable:$true] %s31_s23 }
   0x3   :  { %14 = vsyncpa [#allocation8], 0  ;;  %s688_s24 = smov [#allocation9]   ;;  %s20_s28 = sshll.u32 %s767_s0, 4  ;;  %s21_s28 = int_to_ptr.hbm [resolvable:$true] %s20_s28 }
   0x4   :  { %s33_s25 = sshll.u32 %s688_s24, 4  ;;  %s689_s29 = smov [#allocation6]   ;;  %s34_s25 = int_to_ptr.vmem [resolvable:$true] %s33_s25 }
   0x5   :  { %36 = dma.hbm_to_vmem [thread:$0]  %s32_s23, 64, %s34_s25, [#allocation10]  }
   0x6   :  { %s22_s30 = sshll.u32 %s689_s29, 4  ;;  %s41_s9 = sshll.u32 %s769_s2, 4  ;;  %s23_s30 = int_to_ptr.vmem [resolvable:$true] %s22_s30  ;;  %s42_s9 = int_to_ptr.hbm [resolvable:$true] %s41_s9 }
   0x7   :  { %25 = dma.hbm_to_vmem [thread:$0]  %s21_s28, 64, %s23_s30, [#allocation7]  }
   0x8   :  { %s690_s1 = smov [#allocation11]   ;;  %s56_s13 = sshll.u32 %s771_s4, 4  ;;  %s57_s13 = int_to_ptr.hbm [resolvable:$true] %s56_s13 }
   0x9   :  { %s43_s10 = sshll.u32 %s690_s1, 4  ;;  %s691_s14 = smov 64   ;;  %s44_s10 = int_to_ptr.vmem [resolvable:$true] %s43_s10 }
   0xa   :  { %s692_s0 = smov 4   ;;  %s693_s15 = smov [#allocation12]  }
   0xb   :  { %49 = dma.hbm_to_vmem [thread:$0]  %s42_s9, 1024, %s44_s10, [#allocation10], %s691_s14, %s691_s14, %s692_s0  }
   0xc   :  { %s58_s16 = sshll.u32 %s693_s15, 4  ;;  %s694_s17 = smov 128   ;;  %s59_s16 = int_to_ptr.vmem [resolvable:$true] %s58_s16 }
   0xd   :  { %s695_s18 = smov 8  }
   0xe   :  { %64 = dma.hbm_to_vmem [thread:$0]  %s57_s13, 2048, %s59_s16, [#allocation13], %s694_s17, %s694_s17, %s695_s18  }
   0xf   :  { %680 = dma.done.wait [#allocation7], 64  }
  0x10   :  { %681 = vsyncadd [#allocation7], 4294967232 }
  0x11   :  { %682 = dma.done.wait [#allocation10], 1088  }
  0x12   :  { %683 = vsyncadd [#allocation10], 4294966208 }
  0x13   :  { %684 = dma.done.wait [#allocation13], 2048  }
  0x14   :  { %685 = vsyncadd [#allocation13], 4294965248  ;;  %v521_v0 = vld [vmem:[#allocation11 + $0x38] sm:$0xff]  ;;  %v507_v1 = vld [vmem:[#allocation12 + $0x70] sm:$0xf]  ;;  %vm173_vm0 = vcmask 7168   ;;  %v323_v62 = vlaneseq }
  0x15   :  { %v537_v2 = vld [vmem:[#allocation12 + $0x74] sm:$0xf0]  ;;  %v499_v4 = vld [vmem:[#allocation12 + $0x60] sm:$0xf]  ;;  %v535_v5 = vld [vmem:[#allocation12 + $0x64] sm:$0xf0]  ;;  %157 = vmatpush.bf16.msra.mxu0 %v521_v0 }
  0x16   :  { %v508_v3 = vor.u32 %v537_v2, %v507_v1  ;;  %v520_v6 = vld [vmem:[#allocation11 + $0x30] sm:$0xff]  ;;  %v500_v7 = vor.u32 %v535_v5, %v499_v4  ;;  %v533_v9 = vld [vmem:[#allocation12 + $0x54] sm:$0xf0]  ;;  %v519_v10 = vld [vmem:[#allocation11 + $0x28] sm:$0xff]  ;;  %v696_v55 = vmov -inf   ;;  %v324_v2 = vand.u32 127, %v323_v62 }
  0x17   :  { %v491_v8 = vld [vmem:[#allocation12 + $0x50] sm:$0xf]  ;;  %v483_v12 = vld [vmem:[#allocation12 + $0x40] sm:$0xf]  ;;  %v531_v13 = vld [vmem:[#allocation12 + $0x44] sm:$0xf0] }
  0x18   :  { %280 = vmatpush.bf16.msra.mxu1 %v508_v3  ;;  %v492_v11 = vor.u32 %v533_v9, %v491_v8  ;;  %v518_v14 = vld [vmem:[#allocation11 + $0x20] sm:$0xff]  ;;  %v484_v15 = vor.u32 %v531_v13, %v483_v12  ;;  %v475_v16 = vld [vmem:[#allocation12 + $0x30] sm:$0xf]  ;;  %v529_v17 = vld [vmem:[#allocation12 + $0x34] sm:$0xf0]  ;;  %174 = vst.msk [vmem:[#allocation3] sm:$0xff] %vm173_vm0, %v696_v55 }
  0x19   :  { %158 = vmatpush.bf16.msra.mxu0 %v520_v6  ;;  %v517_v18 = vld [vmem:[#allocation11 + $0x18] sm:$0xff]  ;;  %v476_v19 = vor.u32 %v529_v17, %v475_v16  ;;  %v467_v20 = vld [vmem:[#allocation12 + $0x20] sm:$0xf]  ;;  %v527_v21 = vld [vmem:[#allocation12 + $0x24] sm:$0xf0]  ;;  %vm327_vm1 = vcmp.lt.s32.totalorder %v324_v2, 8 }
  0x1a   :  { %v516_v22 = vld [vmem:[#allocation11 + $0x10] sm:$0xff]  ;;  %v468_v23 = vor.u32 %v527_v21, %v467_v20  ;;  %v525_v25 = vld [vmem:[#allocation12 + $0x14] sm:$0xf0]  ;;  %v515_v26 = vld [vmem:[#allocation11 + $0x8] sm:$0xff]  ;;  %vm330_vm2 = vcmask 64512   ;;  %vm365_vm3 = vcmask 1043456  }
  0x1b   :  { %v459_v24 = vld [vmem:[#allocation12 + $0x10] sm:$0xf]  ;;  %v451_v28 = vld [vmem:[#allocation12] sm:$0xf]  ;;  %v523_v29 = vld [vmem:[#allocation12 + $0x4] sm:$0xf0] }
  0x1c   :  { %281 = vmatpush.bf16.msra.mxu1 %v500_v7  ;;  %v460_v27 = vor.u32 %v525_v25, %v459_v24  ;;  %v514_v30 = vld [vmem:[#allocation11] sm:$0xff]  ;;  %v452_v31 = vor.u32 %v523_v29, %v451_v28  ;;  %v88_v32 = vld [vmem:[#allocation6] sm:$0xf]  ;;  %v177_v33 = vld [vmem:[#allocation9] sm:$0xf]  ;;  %s405_s23 = sshll.u32 %s773_s6, 4  ;;  %s406_s23 = int_to_ptr.hbm [resolvable:$true] %s405_s23 }
  0x1d   :  { %159 = vmatpush.bf16.msra.mxu0 %v519_v10  ;;  %v750_v34 = vld [vmem:[%s772_s5] sm:$0x3]  ;;  %v536_v47 = vld [vmem:[#allocation12 + $0x74] sm:$0xf]  ;;  %v509_v48 = vld [vmem:[#allocation12 + $0x78] sm:$0xf0] }
  0x1e   :  { %v553_v35 = vld [vmem:[%s770_s3] ss:$0 sm:$0xff]  ;;  %v196_v36 = vperm.slane %v750_v34, 0  ;;  %v512_v50 = vor.u32 %v536_v47, %v509_v48  ;;  %v501_v51 = vld [vmem:[#allocation12 + $0x68] sm:$0xf0]  ;;  %v197_v20 = vperm.slane %v750_v34, 1 }
  0x1f   :  { %v534_v49 = vld [vmem:[#allocation12 + $0x64] sm:$0xf]  ;;  %v532_v53 = vld [vmem:[#allocation12 + $0x54] sm:$0xf]  ;;  %v493_v54 = vld [vmem:[#allocation12 + $0x58] sm:$0xf0] }
  0x20   :  { %282 = vmatpush.bf16.msra.mxu1 %v492_v11  ;;  %293 = vmatpush.bf16.msra.mxu2 %v512_v50  ;;  %v504_v52 = vor.u32 %v534_v49, %v501_v51  ;;  %v496_v56 = vor.u32 %v532_v53, %v493_v54  ;;  %v530_v57 = vld [vmem:[#allocation12 + $0x44] sm:$0xf]  ;;  %v485_v58 = vld [vmem:[#allocation12 + $0x48] sm:$0xf0]  ;;  %v528_v60 = vld [vmem:[#allocation12 + $0x34] sm:$0xf] }
  0x21   :  { %160 = vmatpush.bf16.msra.mxu0 %v518_v14  ;;  %v488_v59 = vor.u32 %v530_v57, %v485_v58  ;;  %v477_v61 = vld [vmem:[#allocation12 + $0x38] sm:$0xf0]  ;;  %v526_v0 = vld [vmem:[#allocation12 + $0x24] sm:$0xf]  ;;  %v469_v1 = vld [vmem:[#allocation12 + $0x28] sm:$0xf0] }
  0x22   :  { %v480_v63 = vor.u32 %v528_v60, %v477_v61  ;;  %v472_v3 = vor.u32 %v526_v0, %v469_v1  ;;  %v524_v4 = vld [vmem:[#allocation12 + $0x14] sm:$0xf]  ;;  %v461_v5 = vld [vmem:[#allocation12 + $0x18] sm:$0xf0]  ;;  %v522_v8 = vld [vmem:[#allocation12 + $0x4] sm:$0xf] }
  0x23   :  { %v464_v6 = vor.u32 %v524_v4, %v461_v5  ;;  %v453_v9 = vld [vmem:[#allocation12 + $0x8] sm:$0xf0]  ;;  %v697_v14 = vmov 0   ;;  %s699_s3 = smov [#allocation14]  }
  0x24   :  { %283 = vmatpush.bf16.msra.mxu1 %v484_v15  ;;  %294 = vmatpush.bf16.msra.mxu2 %v504_v52  ;;  %v456_v12 = vor.u32 %v522_v8, %v453_v9  ;;  %v698_v15 = vmov 0.0   ;;  %v329_v16 = vld [vmem:[#allocation3] sm:$0xff]  ;;  %s403_s5 = sshll.u32 %s699_s3, 4  ;;  %s404_s5 = int_to_ptr.vmem [resolvable:$true] %s403_s5 }
  0x25   :  { %161 = vmatpush.bf16.msra.mxu0 %v517_v18  ;;  %550 = vset.pattern.permute.xlu0 %v697_v14  ;;  %175 = vst.msk [vmem:[#allocation4] sm:$0xff] %vm173_vm0, %v698_v15 }
  0x26   :  { %551 = vset.pattern.permute.xlu1 %v697_v14  ;;  %552 = vset.pattern.permute.xlu2 %v697_v14 }
  0x28   :  { %284 = vmatpush.bf16.msra.mxu1 %v476_v19  ;;  %295 = vmatpush.bf16.msra.mxu2 %v496_v56 }
  0x29   :  { %162 = vmatpush.bf16.msra.mxu0 %v516_v22 }
  0x2c   :  { %285 = vmatpush.bf16.msra.mxu1 %v468_v23  ;;  %296 = vmatpush.bf16.msra.mxu2 %v488_v59  ;;  %v346_v34 = vld [vmem:[#allocation4] sm:$0xff] }
  0x2d   :  { %163 = vmatpush.bf16.msra.mxu0 %v515_v26 }
  0x30   :  { %286 = vmatpush.bf16.msra.mxu1 %v460_v27  ;;  %297 = vmatpush.bf16.msra.mxu2 %v480_v63 }
  0x31   :  { %164 = vmatpush.bf16.msra.mxu0 %v514_v30 }
  0x34   :  { %287 = vmatpush.bf16.msra.mxu1 %v452_v31  ;;  %165 = vmatmul.bf16.vlgmr.msra.gmra.mxu0 %v88_v32 }
  0x35   :  { %298 = vmatpush.bf16.msra.mxu2 %v472_v3 }
  0x37   :  { %288 = vmatmul.bf16.vlgmr.msra.gmra.mxu1 %v177_v33 }
  0x39   :  { %299 = vmatpush.bf16.msra.mxu2 %v464_v6 }
  0x3d   :  { %300 = vmatpush.bf16.msra.mxu2 %v456_v12 }
  0x40   :  { %301 = vmatmul.bf16.vlgmr.msra.gmra.mxu2 %v177_v33 }
  0xb1   :  { %v166_v37 = vpop.f32.mrf.mxu0 }
  0xb2   :  { %v167_v38 = vadd.f32 %v553_v35, %v166_v37 }
  0xb4   :  { %v289_v39 = vpop.f32.mrf.mxu1  ;;  %v170_v41 = vmul.f32 0.17677669, %v167_v38 }
  0xb5   :  { %v290_v40 = vadd.f32 %v289_v39, %v196_v36 }
  0xb6   :  { %v171_v43 = vpack.c.bf16 %v170_v41, %v170_v41 }
  0xb7   :  { %v306_v42 = vpack.c.bf16 %v290_v40, %v290_v40 }
  0xb8   :  { %172 = vst [vmem:[#allocation2] sm:$0xf] %v171_v43 }
  0xb9   :  { %316 = vmatpush.bf16.xpose.msra.mxu3 %v306_v42  ;;  %v168_v44 = vpop.f32.mrf.mxu0 }
  0xbc   :  { %v291_v45 = vpop.f32.mrf.mxu1 }
  0xbf   :  { %v308_v46 = vld [vmem:[#allocation2] sm:$0xf] }
  0xc0   :  { %317 = vmatmul.bf16.vlgmr.msra.gmra.mxu3 %v308_v46 }
  0xc3   :  { %v302_v21 = vpop.f32.mrf.mxu2 }
  0xc4   :  { %v303_v22 = vadd.f32 %v302_v21, %v197_v20 }
  0xc6   :  { %v307_v23 = vpack.c.bf16 %v303_v22, %v303_v22 }
  0xc8   :  { %v367_v24 = vsel %vm365_vm3, %v307_v23, 0 }
  0xc9   :  { %376 = vmatpush.bf16.msrb.mxu3 %v367_v24 }
  0xcb   :  { %v304_v25 = vpop.f32.mrf.mxu2 }
 0x143   :  { %v318_v7 = vpop.f32.mrf.mxu3 }
 0x144   :  { %v328_v10 = vsel %vm327_vm1, %v318_v7, -inf }
 0x145   :  { %v331_v11 = vsel %vm330_vm2, %v328_v10, -inf }
 0x146   :  { %332 = vmax.xlane.f32.xlu0 %v331_v11 }
 0x14b   :  { %v320_v13 = vpop.f32.mrf.mxu3 }
 0x1b9   :  { %v333_v17 = vpop.xlane.xlu0 %332 }
 0x1ba   :  { %v334_v18 = vmax.f32 %v329_v16, %v333_v17 }
 0x1bc   :  { %v335_v19 = vsub.f32 %v329_v16, %v334_v18  ;;  %384 = vst.msk [vmem:[#allocation3] sm:$0xff] %vm173_vm0, %v334_v18  ;;  %340 = vperm.xlu0 %550, %v334_v18  }
 0x1be   :  { %v336_v32 = vmul.f32 1.442695, %v335_v19 }
 0x22e   :  { %v341_v26 = vpop.permute.xlu0 %340 }
 0x22f   :  { %v343_v27 = vsub.f32 %v328_v10, %v341_v26 }
 0x231   :  { %v344_v28 = vmul.f32 1.442695, %v343_v27 }
 0x233   :  { %554 = vpow2.f32 %v344_v28 }
 0x234   :  { %556 = vpow2.f32 %v336_v32 }
 0x239   :  { %v555_v29 = vpop.eup %554 }
 0x23a   :  { %v348_v30 = vsel %vm330_vm2, %v555_v29, 0.0  ;;  %v361_v31 = vpack.c.bf16 %v555_v29, %v555_v29  ;;  %v557_v33 = vpop.eup %556 }
 0x23b   :  { %349 = vadd.xlane.f32.xlu1 %v348_v30  ;;  %v347_v35 = vmul.f32 %v557_v33, %v346_v34 }
 0x23c   :  { %513 = vmatmul.msk.bf16.vlgmr.msrb.gmra.mxu3 %vm330_vm2, %v361_v31 }
 0x254   :  { %357 = vperm.xlu1 %551, %v557_v33  }
 0x2ae   :  { %v350_v36 = vpop.xlane.xlu1 %349 }
 0x2af   :  { %v351_v37 = vadd.f32 %v350_v36, %v347_v35 }
 0x2b1   :  { %353 = vst.msk [vmem:[#allocation4] sm:$0xff] %vm173_vm0, %v351_v37 }
 0x2b8   :  { %v388_v38 = vld [vmem:[#allocation4] sm:$0xff] }
 0x2b9   :  { %558 = vrcp.f32 %v388_v38 }
 0x2bf   :  { %v559_v39 = vpop.eup %558  ;;  %v378_v40 = vpop.f32.mrf.mxu3 }
 0x2c0   :  { %393 = vperm.xlu2 %552, %v559_v39  }
 0x2c6   :  { %v358_v42 = vpop.permute.xlu1 %357 }
 0x2c7   :  { %v380_v41 = vpop.f32.mrf.mxu3  ;;  %v360_v43 = vmul.f32 0.0, %v358_v42 }
 0x2c9   :  { %v382_v44 = vadd.f32 %v378_v40, %v360_v43 }
 0x31a   :  { %v394_v45 = vpop.permute.xlu2 %393 }
 0x31b   :  { %v396_v46 = vmul.f32 %v394_v45, %v382_v44 }
 0x31d   :  { %397 = vst [vmem:[#allocation14] sm:$0xff] %v396_v46 }
 0x31e   :  { %408 = dma.vmem_to_hbm [thread:$0]  %s404_s5, 128, %s406_s23, [#allocation8]  }
 0x31f   :  { %686 = dma.done.wait [#allocation8], 128  }
 0x320   :  { %687 = vsyncadd [#allocation8], 4294967168 }
 0x321   :  { %413 = vsyncpa [#allocation7], 1 }
 0x322   :  { %414 = vsyncpa [#allocation10], 1 }
 0x323   :  { %415 = vsyncpa [#allocation13], 1 }
 0x324   :  { %416 = vsyncpa [#allocation8], 1 }

</bundles_post_ra>
